<compile_context>
chip_gen: v7x
topology: tpu7x:2x2x1
jax: 0.10.0
libtpu: 0.0.40
codegen_flags: <defaults>
</compile_context>

<pallas_src>
import functools

import jax
import jax.numpy as jnp
from jax.experimental import pallas as pl
from jax.experimental.pallas import tpu as pltpu


_EPS_SQ = 1e-24  # (F.normalize eps = 1e-12) ** 2


def _l2norm_f32(x):
    """x / max(||x||_2, eps) computed as x * rsqrt(max(||x||^2, eps^2)) (EUP)."""
    x = x.astype(jnp.float32)
    ss = jnp.sum(x * x, axis=-1, keepdims=True)
    return x * jax.lax.rsqrt(jnp.maximum(ss, _EPS_SQ))


# -----------------------------------------------------------------------------
# Pallas kernel: feature + response distillation losses
# -----------------------------------------------------------------------------
def _kd_loss_kernel(temp_ref, ai_ref, ti_ref, at_ref, tt_ref, out_ref, *, inv_b):
    """out_ref (SMEM, shape (3,)): [img_feature_loss, txt_feature_loss, kl_loss].

    Grid axis 0 iterates over query-row blocks of the student/teacher image
    features; the text-key tiles (at/tt) are the full batch and stay resident.
    """
    i = pl.program_id(0)
    n = pl.num_programs(0)

    # Normalized query row-block and resident key tiles (f32 elementwise math).
    ai = _l2norm_f32(ai_ref[...])        # (bq, D) aligned_img rows
    ti = _l2norm_f32(ti_ref[...])        # (bq, D) teacher_img rows
    at = _l2norm_f32(at_ref[...])        # (B,  D) aligned_txt keys
    tt = _l2norm_f32(tt_ref[...])        # (B,  D) teacher_txt keys

    @pl.when(i == 0)
    def _init():
        out_ref[0] = jnp.float32(0.0)
        out_ref[2] = jnp.float32(0.0)
        # txt-feature cos-sim sum over the full batch (keys fully resident,
        # so compute it exactly once).
        out_ref[1] = jnp.sum(at * tt)

    # img-feature cos-sim partial sum for this row block.
    out_ref[0] = out_ref[0] + jnp.sum(ai * ti)

    # ---- response distillation: temperature-scaled KL over the full key dim ----
    temperature = temp_ref[0]
    scale = 100.0 / temperature

    # Transpose-free contraction over the last dims; bf16 MXU operands
    # (unit-norm vectors -> negligible precision loss for a loss value),
    # f32 accumulation.
    dn = (((1,), (1,)), ((), ()))
    s = jax.lax.dot_general(ai.astype(jnp.bfloat16), at.astype(jnp.bfloat16),
                            dn, preferred_element_type=jnp.float32) * scale
    t = jax.lax.dot_general(ti.astype(jnp.bfloat16), tt.astype(jnp.bfloat16),
                            dn, preferred_element_type=jnp.float32) * scale

    # log_softmax(student / T) along the full key dim.
    s_max = jnp.max(s, axis=-1, keepdims=True)
    s_sh = s - s_max
    log_p = s_sh - jnp.log(jnp.sum(jnp.exp(s_sh), axis=-1, keepdims=True))

    # softmax(teacher / T) and its log.
    t_max = jnp.max(t, axis=-1, keepdims=True)
    t_sh = t - t_max
    t_exp = jnp.exp(t_sh)
    t_sum = jnp.sum(t_exp, axis=-1, keepdims=True)
    q = t_exp * pl.reciprocal(t_sum, approx=True)   # EUP reciprocal, VALU-free
    log_q = t_sh - jnp.log(t_sum)

    # KL(q || p) partial sum for this row block.
    out_ref[2] = out_ref[2] + jnp.sum(q * (log_q - log_p))

    @pl.when(i == n - 1)
    def _finalize():
        out_ref[0] = 1.0 - out_ref[0] * inv_b                      # img feature loss
        out_ref[1] = 1.0 - out_ref[1] * inv_b                      # txt feature loss
        out_ref[2] = out_ref[2] * inv_b * temperature * temperature  # batchmean * T^2


def _pick_block_rows(b):
    """Row-block size: full batch when small, else the largest 8-aligned divisor."""
    if b <= 512:
        return b
    for cand in (512, 256, 128, 64, 32, 16, 8):
        if b % cand == 0:
            return cand
    return b  # fallback: single block (B not 8-divisible)


def _kd_losses_pallas(aligned_img, aligned_txt, teacher_img, teacher_txt, temperature):
    """Returns (img_feature_loss, txt_feature_loss, response_kl_loss) as f32 scalars."""
    b, d = aligned_img.shape
    block_rows = _pick_block_rows(b)
    num_blocks = b // block_rows
    temp = jnp.asarray([temperature], dtype=jnp.float32)

    # TODO(synk): for very large B*D, also tile the key dimension (two-pass /
    # online log-sum-exp) and tune vmem_limit_bytes per chip generation.
    q_spec = pl.BlockSpec((block_rows, d), lambda i: (i, 0))   # streamed row blocks
    k_spec = pl.BlockSpec((b, d), lambda i: (0, 0))            # resident full keys
    smem = pltpu.MemorySpace.SMEM

    out = pl.pallas_call(
        functools.partial(_kd_loss_kernel, inv_b=1.0 / float(b)),
        grid=(num_blocks,),
        in_specs=[
            pl.BlockSpec(memory_space=smem),  # temperature scalar
            q_spec,                           # aligned_img rows
            q_spec,                           # teacher_img rows
            k_spec,                           # aligned_txt keys
            k_spec,                           # teacher_txt keys
        ],
        out_specs=pl.BlockSpec(memory_space=smem),   # fused (3,) scalar output
        out_shape=jax.ShapeDtypeStruct((3,), jnp.float32),
        compiler_params=pltpu.CompilerParams(
            # The single grid axis accumulates into the same output block, so
            # it is a reduction axis -> "arbitrary".
            dimension_semantics=("arbitrary",)),
    )(temp, aligned_img, teacher_img, aligned_txt, teacher_txt)
    return out[0], out[1], out[2]


# -----------------------------------------------------------------------------
# Differentiable wrapper: Pallas forward, pure-JAX backward (pallas_call has no
# automatic VJP).
# -----------------------------------------------------------------------------
def _kd_losses_ref(ai, at, ti, tt, temperature):
    ai, at, ti, tt = _l2norm_f32(ai), _l2norm_f32(at), _l2norm_f32(ti), _l2norm_f32(tt)
    b = ai.shape[0]
    img = 1.0 - jnp.sum(ai * ti) / b
    txt = 1.0 - jnp.sum(at * tt) / b
    scale = 100.0 / temperature
    s = (ai @ at.T) * scale
    t = (ti @ tt.T) * scale
    log_p = jax.nn.log_softmax(s, axis=-1)
    log_q = jax.nn.log_softmax(t, axis=-1)
    q = jnp.exp(log_q)
    kl = jnp.sum(q * (log_q - log_p)) / b * (temperature ** 2)
    return img, txt, kl


@functools.partial(jax.custom_vjp, nondiff_argnums=(4,))
def kd_losses(aligned_img, aligned_txt, teacher_img, teacher_txt, temperature):
    return _kd_losses_pallas(aligned_img, aligned_txt, teacher_img, teacher_txt,
                             temperature)


def _kd_losses_fwd(aligned_img, aligned_txt, teacher_img, teacher_txt, temperature):
    out = _kd_losses_pallas(aligned_img, aligned_txt, teacher_img, teacher_txt,
                            temperature)
    return out, (aligned_img, aligned_txt, teacher_img, teacher_txt)


def _kd_losses_bwd(temperature, res, g):
    ai, at, ti, tt = res
    _, vjp = jax.vjp(lambda a, b_, c, d: _kd_losses_ref(a, b_, c, d, temperature),
                     ai, at, ti, tt)
    return vjp(g)


kd_losses.defvjp(_kd_losses_fwd, _kd_losses_bwd)


# -----------------------------------------------------------------------------
# Host-side trainer (glue): phase schedule, temperature, loss balancer weights
# -----------------------------------------------------------------------------
class AutomaticLossBalancerJAX:
    def __init__(self, loss_names, initial_weights=None, adaptation_rate=0.01):
        self.loss_names = loss_names
        self.num_losses = len(loss_names)
        self.adaptation_rate = adaptation_rate
        if initial_weights is None:
            initial_weights = [1.0 / self.num_losses] * self.num_losses
        self.log_weights = jnp.log(jnp.asarray(initial_weights, dtype=jnp.float32))
        self.strategy = 'gradient_norm'
        self.best_val_performance = float('inf')
        self.performance_plateau_count = 0

    @property
    def weights(self):
        return jax.nn.softmax(self.log_weights)

    def _gradient_norm_weighting(self, losses, gradients):
        if gradients is None:
            return self.weights
        grad_norms = jnp.asarray(
            [float(gradients.get(name, 1.0)) for name in self.loss_names],
            dtype=jnp.float32)
        grad_norms = jnp.clip(grad_norms, 1e-8)
        target_norm = jnp.mean(grad_norms)
        adj = target_norm / grad_norms
        new_w = self.weights * adj
        return new_w / jnp.sum(new_w)

    def compute_adaptive_weights(self, losses, gradients=None, step=None):
        # TODO(synk): 'magnitude' / 'uncertainty' strategies (host-side deque
        # statistics) and strategy switching are host-only Python state and are
        # not reproduced; the default 'gradient_norm' strategy is exact.
        return self._gradient_norm_weighting(losses, gradients)

    def update_weights(self, losses, gradients=None, val_performance=None, step=None):
        adaptive = self.compute_adaptive_weights(losses, gradients, step)
        current = self.weights
        new_w = (1.0 - self.adaptation_rate) * current + self.adaptation_rate * adaptive
        self.log_weights = jnp.log(new_w)
        if val_performance is not None:
            if val_performance < self.best_val_performance:
                self.best_val_performance = val_performance
                self.performance_plateau_count = 0
            else:
                self.performance_plateau_count += 1


class ProgressiveKDTrainerPallas:
    def __init__(self, config):
        self.config = config
        self.phase_1_steps = config.get('phase_1_steps', 1000)
        self.phase_2_steps = config.get('phase_2_steps', 2000)
        self.phase_3_steps = config.get('phase_3_steps', 3000)
        self.loss_names = ['original', 'img_feature', 'txt_feature', 'response']
        self.loss_balancer = AutomaticLossBalancerJAX(
            loss_names=self.loss_names,
            initial_weights=[0.8, 0.1, 0.1, 0.0],
            adaptation_rate=config.get('adaptation_rate', 0.01))
        self.min_temperature = config.get('min_temperature', 4.0)
        self.max_temperature = config.get('max_temperature', 8.0)
        self.temperature = 8.0
        self.step_count = 0

    # --- temperature schedule (host-side, matches PyTorch buffer update) ---
    def _update_temperature(self, step):
        if step < self.phase_1_steps:
            self.temperature = float(self.max_temperature)
        elif step < self.phase_2_steps:
            progress = (step - self.phase_1_steps) / (self.phase_2_steps - self.phase_1_steps)
            self.temperature = float(
                self.max_temperature - progress * (self.max_temperature - self.min_temperature))
        else:
            self.temperature = float(self.min_temperature)

    def _get_active_losses(self, step):
        active = {'original': True}
        active['img_feature'] = step >= self.phase_1_steps
        active['txt_feature'] = step >= self.phase_1_steps
        active['response'] = step >= self.phase_2_steps
        return active

    def _compute_individual_losses(self, student_outputs, step):
        losses = {}
        losses['original'] = (student_outputs['Em'] - student_outputs['Ej']).astype(jnp.float32)

        zero = jnp.float32(0.0)
        need_feat = ('aligned_img_feats' in student_outputs) and (step >= self.phase_1_steps)
        need_resp = step >= self.phase_2_steps

        if need_feat or need_resp:
            ai = student_outputs['aligned_img_feats']
            at = student_outputs['aligned_txt_feats']
            ti = student_outputs['teacher_image_embeds']
            tt = student_outputs['teacher_text_embeds']
            min_batch = min(ai.shape[0], ti.shape[0])
            ai, at, ti, tt = ai[:min_batch], at[:min_batch], ti[:min_batch], tt[:min_batch]
            img_loss, txt_loss, kl_loss = kd_losses(ai, at, ti, tt, self.temperature)
        else:
            img_loss = txt_loss = kl_loss = zero

        losses['img_feature'] = img_loss if need_feat else zero
        losses['txt_feature'] = txt_loss if need_feat else zero
        losses['response'] = kl_loss if need_resp else zero
        return losses

    def _combine_losses(self, losses, active_losses):
        weights = self.loss_balancer.weights
        total = jnp.float32(0.0)
        for i, name in enumerate(self.loss_names):
            if active_losses.get(name, False):
                total = total + weights[i] * losses[name]
        return total

    def __call__(self, student_outputs, step, gradients=None, val_performance=None):
        self.step_count = step
        self._update_temperature(step)
        losses = self._compute_individual_losses(student_outputs, step)
        active = self._get_active_losses(step)
        self.loss_balancer.update_weights(
            losses=losses, gradients=gradients,
            val_performance=val_performance, step=step)
        total_loss = self._combine_losses(losses, active)
        return total_loss, losses, self.loss_balancer.weights


# -----------------------------------------------------------------------------
if __name__ == "__main__":
    key = jax.random.PRNGKey(0)
    k_em, k_ej, k_ai, k_at, k_ti, k_tt = jax.random.split(key, 6)

    B, D = 8, 32
    student_outputs = {
        'Em': jax.random.normal(k_em, (), dtype=jnp.float32),
        'Ej': jax.random.normal(k_ej, (), dtype=jnp.float32),
        'aligned_img_feats': jax.random.normal(k_ai, (B, D), dtype=jnp.float32),
        'aligned_txt_feats': jax.random.normal(k_at, (B, D), dtype=jnp.float32),
        'teacher_image_embeds': jax.random.normal(k_ti, (B, D), dtype=jnp.float32),
        'teacher_text_embeds': jax.random.normal(k_tt, (B, D), dtype=jnp.float32),
    }

    config = {'phase_1_steps': 10, 'phase_2_steps': 20, 'phase_3_steps': 30,
              'adaptation_rate': 0.01, 'min_temperature': 4.0, 'max_temperature': 8.0}
    trainer = ProgressiveKDTrainerPallas(config)

    # step >= phase_2_steps -> all four loss components active, full kernel path.
    total_loss, losses, weights = trainer(student_outputs, step=25, gradients=None)

    jax.block_until_ready(total_loss)
    jax.block_until_ready(weights)
    for v in losses.values():
        jax.block_until_ready(v)

    print("KERNEL_OK")
</pallas_src>

<mosaic_0001>
module attributes {stable_mosaic.version = 11 : i64} {
  func.func @_kd_loss_kernel(%arg0: i32, %arg1: memref<1xf32, #tpu.memory_space<smem>>, %arg2: memref<8x32xf32, #tpu.memory_space<vmem>>, %arg3: memref<8x32xf32, #tpu.memory_space<vmem>>, %arg4: memref<8x32xf32, #tpu.memory_space<vmem>>, %arg5: memref<8x32xf32, #tpu.memory_space<vmem>>, %arg6: memref<3xf32, #tpu.memory_space<smem>>) attributes {dimension_semantics = [#tpu.dimension_semantics<arbitrary>], iteration_bounds = array<i64: 1>, scalar_prefetch = 0 : i64, scratch_operands = 0 : i64, tpu.core_type = #tpu.core_type<tc>, window_params = [{transform_indices = @transform_0, window_bounds = array<i64: 1>}, {transform_indices = @transform_1, window_bounds = array<i64: 8, 32>}, {transform_indices = @transform_2, window_bounds = array<i64: 8, 32>}, {pipeline_mode = #tpu.pipeline_mode<synchronous>, transform_indices = @transform_3, window_bounds = array<i64: 8, 32>}, {pipeline_mode = #tpu.pipeline_mode<synchronous>, transform_indices = @transform_4, window_bounds = array<i64: 8, 32>}, {transform_indices = @transform_5, window_bounds = array<i64: 3>}]} {
    %c0 = arith.constant 0 : index
    %c0_0 = arith.constant 0 : index
    %0 = vector.load %arg2[%c0, %c0_0] : memref<8x32xf32, #tpu.memory_space<vmem>>, vector<8x32xf32>
    %1 = arith.mulf %0, %0 : vector<8x32xf32>
    %cst = arith.constant dense<0.000000e+00> : vector<8xf32>
    %2 = vector.multi_reduction <add>, %1, %cst [1] : vector<8x32xf32> to vector<8xf32>
    %3 = vector.shape_cast %2 : vector<8xf32> to vector<8x1xf32>
    %cst_1 = arith.constant 1.000000e-24 : f32
    %4 = vector.broadcast %cst_1 : f32 to vector<8x1xf32>
    %5 = arith.maximumf %3, %4 : vector<8x1xf32>
    %6 = math.rsqrt %5 : vector<8x1xf32>
    %7 = vector.broadcast %6 : vector<8x1xf32> to vector<8x32xf32>
    %8 = arith.mulf %0, %7 : vector<8x32xf32>
    %c0_2 = arith.constant 0 : index
    %c0_3 = arith.constant 0 : index
    %9 = vector.load %arg3[%c0_2, %c0_3] : memref<8x32xf32, #tpu.memory_space<vmem>>, vector<8x32xf32>
    %10 = arith.mulf %9, %9 : vector<8x32xf32>
    %cst_4 = arith.constant dense<0.000000e+00> : vector<8xf32>
    %11 = vector.multi_reduction <add>, %10, %cst_4 [1] : vector<8x32xf32> to vector<8xf32>
    %12 = vector.shape_cast %11 : vector<8xf32> to vector<8x1xf32>
    %cst_5 = arith.constant 1.000000e-24 : f32
    %13 = vector.broadcast %cst_5 : f32 to vector<8x1xf32>
    %14 = arith.maximumf %12, %13 : vector<8x1xf32>
    %15 = math.rsqrt %14 : vector<8x1xf32>
    %16 = vector.broadcast %15 : vector<8x1xf32> to vector<8x32xf32>
    %17 = arith.mulf %9, %16 : vector<8x32xf32>
    %c0_6 = arith.constant 0 : index
    %c0_7 = arith.constant 0 : index
    %18 = vector.load %arg4[%c0_6, %c0_7] : memref<8x32xf32, #tpu.memory_space<vmem>>, vector<8x32xf32>
    %19 = arith.mulf %18, %18 : vector<8x32xf32>
    %cst_8 = arith.constant dense<0.000000e+00> : vector<8xf32>
    %20 = vector.multi_reduction <add>, %19, %cst_8 [1] : vector<8x32xf32> to vector<8xf32>
    %21 = vector.shape_cast %20 : vector<8xf32> to vector<8x1xf32>
    %cst_9 = arith.constant 1.000000e-24 : f32
    %22 = vector.broadcast %cst_9 : f32 to vector<8x1xf32>
    %23 = arith.maximumf %21, %22 : vector<8x1xf32>
    %24 = math.rsqrt %23 : vector<8x1xf32>
    %25 = vector.broadcast %24 : vector<8x1xf32> to vector<8x32xf32>
    %26 = arith.mulf %18, %25 : vector<8x32xf32>
    %c0_10 = arith.constant 0 : index
    %c0_11 = arith.constant 0 : index
    %27 = vector.load %arg5[%c0_10, %c0_11] : memref<8x32xf32, #tpu.memory_space<vmem>>, vector<8x32xf32>
    %28 = arith.mulf %27, %27 : vector<8x32xf32>
    %cst_12 = arith.constant dense<0.000000e+00> : vector<8xf32>
    %29 = vector.multi_reduction <add>, %28, %cst_12 [1] : vector<8x32xf32> to vector<8xf32>
    %30 = vector.shape_cast %29 : vector<8xf32> to vector<8x1xf32>
    %cst_13 = arith.constant 1.000000e-24 : f32
    %31 = vector.broadcast %cst_13 : f32 to vector<8x1xf32>
    %32 = arith.maximumf %30, %31 : vector<8x1xf32>
    %33 = math.rsqrt %32 : vector<8x1xf32>
    %34 = vector.broadcast %33 : vector<8x1xf32> to vector<8x32xf32>
    %35 = arith.mulf %27, %34 : vector<8x32xf32>
    %c0_i32 = arith.constant 0 : i32
    %36 = arith.cmpi eq, %arg0, %c0_i32 : i32
    %37 = arith.extui %36 : i1 to i32
    %c0_i32_14 = arith.constant 0 : i32
    %38 = arith.cmpi ne, %37, %c0_i32_14 : i32
    scf.if %38 {
      %cst_30 = arith.constant 0.000000e+00 : f32
      %c0_31 = arith.constant 0 : index
      %94 = memref.load %arg6[%c0_31] : memref<3xf32, #tpu.memory_space<smem>>
      memref.store %cst_30, %arg6[%c0_31] : memref<3xf32, #tpu.memory_space<smem>>
      %cst_32 = arith.constant 0.000000e+00 : f32
      %c2_33 = arith.constant 2 : index
      %95 = memref.load %arg6[%c2_33] : memref<3xf32, #tpu.memory_space<smem>>
      memref.store %cst_32, %arg6[%c2_33] : memref<3xf32, #tpu.memory_space<smem>>
      %96 = arith.mulf %26, %35 : vector<8x32xf32>
      %97 = vector.shape_cast %96 : vector<8x32xf32> to vector<1x8x32xf32>
      %cst_34 = arith.constant dense<0.000000e+00> : vector<1xf32>
      %98 = vector.multi_reduction <add>, %97, %cst_34 [1, 2] : vector<1x8x32xf32> to vector<1xf32>
      %99 = vector.shape_cast %98 : vector<1xf32> to vector<1x1x1xf32>
      %100 = vector.extract %99[0, 0, 0] : f32 from vector<1x1x1xf32>
      %c1 = arith.constant 1 : index
      %101 = memref.load %arg6[%c1] : memref<3xf32, #tpu.memory_space<smem>>
      memref.store %100, %arg6[%c1] : memref<3xf32, #tpu.memory_space<smem>>
    } else {
    }
    %c0_15 = arith.constant 0 : index
    %39 = memref.load %arg6[%c0_15] : memref<3xf32, #tpu.memory_space<smem>>
    %40 = arith.mulf %8, %17 : vector<8x32xf32>
    %41 = vector.shape_cast %40 : vector<8x32xf32> to vector<1x8x32xf32>
    %cst_16 = arith.constant dense<0.000000e+00> : vector<1xf32>
    %42 = vector.multi_reduction <add>, %41, %cst_16 [1, 2] : vector<1x8x32xf32> to vector<1xf32>
    %43 = vector.shape_cast %42 : vector<1xf32> to vector<1x1x1xf32>
    %44 = vector.extract %43[0, 0, 0] : f32 from vector<1x1x1xf32>
    %45 = arith.addf %39, %44 : f32
    %c0_17 = arith.constant 0 : index
    %46 = memref.load %arg6[%c0_17] : memref<3xf32, #tpu.memory_space<smem>>
    memref.store %45, %arg6[%c0_17] : memref<3xf32, #tpu.memory_space<smem>>
    %c0_18 = arith.constant 0 : index
    %47 = memref.load %arg1[%c0_18] : memref<1xf32, #tpu.memory_space<smem>>
    %cst_19 = arith.constant 1.000000e+02 : f32
    %48 = arith.divf %cst_19, %47 : f32
    %49 = arith.truncf %8 : vector<8x32xf32> to vector<8x32xbf16>
    %50 = arith.truncf %26 : vector<8x32xf32> to vector<8x32xbf16>
    %cst_20 = arith.constant dense<0.000000e+00> : vector<8x8xf32>
    %51 = tpu.matmul %49, %50, %cst_20 {dimension_numbers = #tpu.dot_dimension_numbers<[1], [1], [0], [0], [0, 0, 1, 0], [], []>} : vector<8x32xbf16>, vector<8x32xbf16>, vector<8x8xf32> -> vector<8x8xf32>
    %52 = vector.broadcast %48 : f32 to vector<8x8xf32>
    %53 = arith.mulf %51, %52 : vector<8x8xf32>
    %54 = arith.truncf %17 : vector<8x32xf32> to vector<8x32xbf16>
    %55 = arith.truncf %35 : vector<8x32xf32> to vector<8x32xbf16>
    %cst_21 = arith.constant dense<0.000000e+00> : vector<8x8xf32>
    %56 = tpu.matmul %54, %55, %cst_21 {dimension_numbers = #tpu.dot_dimension_numbers<[1], [1], [0], [0], [0, 0, 1, 0], [], []>} : vector<8x32xbf16>, vector<8x32xbf16>, vector<8x8xf32> -> vector<8x8xf32>
    %57 = vector.broadcast %48 : f32 to vector<8x8xf32>
    %58 = arith.mulf %56, %57 : vector<8x8xf32>
    %cst_22 = arith.constant dense<0xFF800000> : vector<8xf32>
    %59 = vector.multi_reduction <maximumf>, %53, %cst_22 [1] : vector<8x8xf32> to vector<8xf32>
    %60 = vector.shape_cast %59 : vector<8xf32> to vector<8x1xf32>
    %61 = vector.broadcast %60 : vector<8x1xf32> to vector<8x8xf32>
    %62 = arith.subf %53, %61 : vector<8x8xf32>
    %63 = math.exp %62 : vector<8x8xf32>
    %cst_23 = arith.constant dense<0.000000e+00> : vector<8xf32>
    %64 = vector.multi_reduction <add>, %63, %cst_23 [1] : vector<8x8xf32> to vector<8xf32>
    %65 = vector.shape_cast %64 : vector<8xf32> to vector<8x1xf32>
    %66 = math.log %65 : vector<8x1xf32>
    %67 = vector.broadcast %66 : vector<8x1xf32> to vector<8x8xf32>
    %68 = arith.subf %62, %67 : vector<8x8xf32>
    %cst_24 = arith.constant dense<0xFF800000> : vector<8xf32>
    %69 = vector.multi_reduction <maximumf>, %58, %cst_24 [1] : vector<8x8xf32> to vector<8xf32>
    %70 = vector.shape_cast %69 : vector<8xf32> to vector<8x1xf32>
    %71 = vector.broadcast %70 : vector<8x1xf32> to vector<8x8xf32>
    %72 = arith.subf %58, %71 : vector<8x8xf32>
    %73 = math.exp %72 : vector<8x8xf32>
    %cst_25 = arith.constant dense<0.000000e+00> : vector<8xf32>
    %74 = vector.multi_reduction <add>, %73, %cst_25 [1] : vector<8x8xf32> to vector<8xf32>
    %75 = vector.shape_cast %74 : vector<8xf32> to vector<8x1xf32>
    %76 = tpu.reciprocal %75 {approx = true} : vector<8x1xf32> -> vector<8x1xf32>
    %77 = vector.broadcast %76 : vector<8x1xf32> to vector<8x8xf32>
    %78 = arith.mulf %73, %77 : vector<8x8xf32>
    %79 = math.log %75 : vector<8x1xf32>
    %80 = vector.broadcast %79 : vector<8x1xf32> to vector<8x8xf32>
    %81 = arith.subf %72, %80 : vector<8x8xf32>
    %c2 = arith.constant 2 : index
    %82 = memref.load %arg6[%c2] : memref<3xf32, #tpu.memory_space<smem>>
    %83 = arith.subf %81, %68 : vector<8x8xf32>
    %84 = arith.mulf %78, %83 : vector<8x8xf32>
    %85 = vector.shape_cast %84 : vector<8x8xf32> to vector<1x8x8xf32>
    %cst_26 = arith.constant dense<0.000000e+00> : vector<1xf32>
    %86 = vector.multi_reduction <add>, %85, %cst_26 [1, 2] : vector<1x8x8xf32> to vector<1xf32>
    %87 = vector.shape_cast %86 : vector<1xf32> to vector<1x1x1xf32>
    %88 = vector.extract %87[0, 0, 0] : f32 from vector<1x1x1xf32>
    %89 = arith.addf %82, %88 : f32
    %c2_27 = arith.constant 2 : index
    %90 = memref.load %arg6[%c2_27] : memref<3xf32, #tpu.memory_space<smem>>
    memref.store %89, %arg6[%c2_27] : memref<3xf32, #tpu.memory_space<smem>>
    %c0_i32_28 = arith.constant 0 : i32
    %91 = arith.cmpi eq, %arg0, %c0_i32_28 : i32
    %92 = arith.extui %91 : i1 to i32
    %c0_i32_29 = arith.constant 0 : i32
    %93 = arith.cmpi ne, %92, %c0_i32_29 : i32
    scf.if %93 {
      %c0_30 = arith.constant 0 : index
      %94 = memref.load %arg6[%c0_30] : memref<3xf32, #tpu.memory_space<smem>>
      %cst_31 = arith.constant 1.250000e-01 : f32
      %95 = arith.mulf %94, %cst_31 : f32
      %cst_32 = arith.constant 1.000000e+00 : f32
      %96 = arith.subf %cst_32, %95 : f32
      %c0_33 = arith.constant 0 : index
      %97 = memref.load %arg6[%c0_33] : memref<3xf32, #tpu.memory_space<smem>>
      memref.store %96, %arg6[%c0_33] : memref<3xf32, #tpu.memory_space<smem>>
      %c1 = arith.constant 1 : index
      %98 = memref.load %arg6[%c1] : memref<3xf32, #tpu.memory_space<smem>>
      %cst_34 = arith.constant 1.250000e-01 : f32
      %99 = arith.mulf %98, %cst_34 : f32
      %cst_35 = arith.constant 1.000000e+00 : f32
      %100 = arith.subf %cst_35, %99 : f32
      %c1_36 = arith.constant 1 : index
      %101 = memref.load %arg6[%c1_36] : memref<3xf32, #tpu.memory_space<smem>>
      memref.store %100, %arg6[%c1_36] : memref<3xf32, #tpu.memory_space<smem>>
      %c2_37 = arith.constant 2 : index
      %102 = memref.load %arg6[%c2_37] : memref<3xf32, #tpu.memory_space<smem>>
      %cst_38 = arith.constant 1.250000e-01 : f32
      %103 = arith.mulf %102, %cst_38 : f32
      %104 = arith.mulf %103, %47 : f32
      %105 = arith.mulf %104, %47 : f32
      %c2_39 = arith.constant 2 : index
      %106 = memref.load %arg6[%c2_39] : memref<3xf32, #tpu.memory_space<smem>>
      memref.store %105, %arg6[%c2_39] : memref<3xf32, #tpu.memory_space<smem>>
    } else {
    }
    return
  }
  func.func @transform_0(%arg0: i32) -> i32 {
    %c0_i32 = arith.constant 0 : i32
    %c0_i32_0 = arith.constant 0 : i32
    return %c0_i32 : i32
  }
  func.func @transform_1(%arg0: i32) -> (i32, i32) {
    %c0_i32 = arith.constant 0 : i32
    %c0_i32_0 = arith.constant 0 : i32
    return %arg0, %c0_i32 : i32, i32
  }
  func.func @transform_2(%arg0: i32) -> (i32, i32) {
    %c0_i32 = arith.constant 0 : i32
    %c0_i32_0 = arith.constant 0 : i32
    return %arg0, %c0_i32 : i32, i32
  }
  func.func @transform_3(%arg0: i32) -> (i32, i32) {
    %c0_i32 = arith.constant 0 : i32
    %c0_i32_0 = arith.constant 0 : i32
    %c0_i32_1 = arith.constant 0 : i32
    return %c0_i32, %c0_i32_0 : i32, i32
  }
  func.func @transform_4(%arg0: i32) -> (i32, i32) {
    %c0_i32 = arith.constant 0 : i32
    %c0_i32_0 = arith.constant 0 : i32
    %c0_i32_1 = arith.constant 0 : i32
    return %c0_i32, %c0_i32_0 : i32, i32
  }
  func.func @transform_5(%arg0: i32) -> i32 {
    %c0_i32 = arith.constant 0 : i32
    %c0_i32_0 = arith.constant 0 : i32
    return %c0_i32 : i32
  }
}

</mosaic_0001>

<bundles_post_ra>
// kernel: tpu_custom_call.1
= control target key start
LH: loop header
LB: loop body
LE: loop exit
PB: predicated region body
PF: predicated region fallthrough
CT: control target
= control target key end

     0   :  { %11 = vsyncpa [#allocation4], 0  ;;  %s555_s0 = inlined_call_operand.<no memory space> [shape: f32[1], index: 0, kind: input, shape index: {}]   ;;  %s556_s1 = inlined_call_operand.hbm [shape: f32[8,32], index: 1, kind: input, shape index: {}]   ;;  %s557_s2 = inlined_call_operand.hbm [shape: f32[8,32], index: 2, kind: input, shape index: {}]   ;;  %s558_s3 = inlined_call_operand.vmem [shape: f32[8,32], index: 3, kind: input, shape index: {}]   ;;  %s559_s4 = inlined_call_operand.hbm [shape: f32[8,32], index: 4, kind: input, shape index: {}]   ;;  %s560_s5 = inlined_call_operand.hbm [shape: f32[3], index: 5, kind: output, shape index: {}]  }
   0x1   :  { %12 = vsyncpa [#allocation7], 0 }
   0x2   :  { %13 = vsyncpa [#allocation5], 0  ;;  %s444_s18 = smov [#allocation6]   ;;  %s445_s20 = smov [#allocation3]  }
   0x3   :  { %s32_s19 = sshll.u32 %s444_s18, 4  ;;  %s22_s21 = sshll.u32 %s445_s20, 4  ;;  %s33_s19 = int_to_ptr.vmem [resolvable:$true] %s32_s19  ;;  %s23_s21 = int_to_ptr.vmem [resolvable:$true] %s22_s21 }
   0x4   :  { %s362_s24 = scalar_lea.hbm %s557_s2, 128 }
   0x5   :  { %p363_p0 = scmp.ne.s32.totalorder %s557_s2, %s362_s24  ;;  %p366_p1 = scmp.lt.u32.totalorder %s362_s24, %s557_s2 }
   0x7   :  { %p368_p2 = pnand %p366_p1, %p363_p0 }
   0x9   :  { %371 = shalt.err (!%p368_p2)
}
   0xa   :  { %s372_s29 = scalar_lea.vmem %s33_s19, 128  ;;  %p377_p4 = scmp.lt.s32.totalorder %s33_s19, %s33_s19 }
   0xb   :  { %p373_p3 = scmp.ne.s32.totalorder %s33_s19, %s372_s29  ;;  %p378_p5 = scmp.lt.s32.totalorder %s372_s29, %s372_s29 }
   0xd   :  { %p379_p6 = por %p378_p5, %p377_p4 }
   0xf   :  { %p380_p7 = pnand %p379_p6, %p373_p3 }
  0x11   :  { %383 = shalt.err (!%p380_p7)
}
  0x12   :  { %35 = dma.hbm_to_vmem [thread:$0]  %s557_s2, 128, %s33_s19, [#allocation7]  }
  0x13   :  { %s384_s9 = scalar_lea.hbm %s556_s1, 128 }
  0x14   :  { %p385_p8 = scmp.ne.s32.totalorder %s556_s1, %s384_s9  ;;  %p388_p9 = scmp.lt.u32.totalorder %s384_s9, %s556_s1 }
  0x16   :  { %p390_p10 = pnand %p388_p9, %p385_p8 }
  0x18   :  { %393 = shalt.err (!%p390_p10)
}
  0x19   :  { %s394_s14 = scalar_lea.vmem %s23_s21, 128  ;;  %p399_p12 = scmp.lt.s32.totalorder %s23_s21, %s23_s21 }
  0x1a   :  { %p395_p11 = scmp.ne.s32.totalorder %s23_s21, %s394_s14  ;;  %p400_p13 = scmp.lt.s32.totalorder %s394_s14, %s394_s14 }
  0x1c   :  { %p401_p0 = por %p400_p13, %p399_p12 }
  0x1e   :  { %p402_p1 = pnand %p401_p0, %p395_p11 }
  0x20   :  { %405 = shalt.err (!%p402_p1)
}
  0x21   :  { %25 = dma.hbm_to_vmem [thread:$0]  %s556_s1, 128, %s23_s21, [#allocation4]  }
  0x22   :  { %s446_s16 = smov [#allocation8]   ;;  %s406_s20 = scalar_lea.hbm %s559_s4, 128 }
  0x23   :  { %s44_s17 = sshll.u32 %s446_s16, 4  ;;  %p407_p2 = scmp.ne.s32.totalorder %s559_s4, %s406_s20  ;;  %s45_s17 = int_to_ptr.vmem [resolvable:$true] %s44_s17 }
  0x24   :  { %p410_p3 = scmp.lt.u32.totalorder %s406_s20, %s559_s4 }
  0x26   :  { %p412_p4 = pnand %p410_p3, %p407_p2 }
  0x28   :  { %415 = shalt.err (!%p412_p4)
}
  0x29   :  { %s416_s26 = scalar_lea.vmem %s45_s17, 128  ;;  %p421_p6 = scmp.lt.s32.totalorder %s45_s17, %s45_s17 }
  0x2a   :  { %p417_p5 = scmp.ne.s32.totalorder %s45_s17, %s416_s26  ;;  %p422_p7 = scmp.lt.s32.totalorder %s416_s26, %s416_s26 }
  0x2c   :  { %p423_p8 = por %p422_p7, %p421_p6 }
  0x2e   :  { %p424_p9 = pnand %p423_p8, %p417_p5 }
  0x30   :  { %427 = shalt.err (!%p424_p9)
}
  0x31   :  { %47 = dma.hbm_to_vmem [thread:$0]  %s559_s4, 128, %s45_s17, [#allocation7]  }
  0x32   :  { %438 = dma.done.wait [#allocation4], 128  }
  0x33   :  { %439 = vsyncadd [#allocation4], 4294967168 }
  0x34   :  { %440 = dma.done.wait [#allocation7], 256  }
  0x35   :  { %441 = vsyncadd [#allocation7], 4294967040  ;;  %vm60_vm0 = vcmask 261120   ;;  %v75_v0 = vld [vmem:[%s558_s3] sm:$0xff]  ;;  %v83_v2 = vld [vmem:[#allocation8] sm:$0xff]  ;;  %v447_v12 = vmov 0.0   ;;  %v128_v39 = vstv %s555_s0 }
  0x36   :  { %v58_v1 = vld [vmem:[#allocation3] sm:$0xff]  ;;  %v76_v3 = vmul.f32 %v75_v0, %v75_v0  ;;  %v84_v5 = vmul.f32 %v83_v2, %v83_v2  ;;  %v67_v6 = vld [vmem:[#allocation6] sm:$0xff]  ;;  %315 = vmatprep.subr.bf16.mxu0 %v447_v12  ;;  %321 = vmatprep.subr.bf16.mxu1 %v447_v12  ;;  %vm448_vm1 = vmmov 0   ;;  %vm231_vm2 = vcmask 64512   ;;  %s428_s22 = scalar_lea.hbm %s560_s5, 16 }
  0x37   :  { %v59_v4 = vmul.f32 %v58_v1, %v58_v1  ;;  %v68_v7 = vmul.f32 %v67_v6, %v67_v6  ;;  %317 = vmatprep.mubr.msk.bf16.mxu0 %vm448_vm1, %v447_v12  ;;  %323 = vmatprep.mubr.msk.bf16.mxu1 %vm448_vm1, %v447_v12  ;;  %p429_p10 = scmp.ne.s32.totalorder %s560_s5, %s428_s22  ;;  %p432_p11 = scmp.lt.u32.totalorder %s428_s22, %s560_s5 }
  0x38   :  { %v77_v8 = vsel %vm60_vm0, %v76_v3, 0.0  ;;  %v85_v10 = vsel %vm60_vm0, %v84_v5, 0.0 }
  0x39   :  { %v61_v9 = vsel %vm60_vm0, %v59_v4, 0.0  ;;  %78 = vadd.xlane.f32.xlu0 %v77_v8  ;;  %v69_v11 = vsel %vm60_vm0, %v68_v7, 0.0  ;;  %p434_p12 = pnand %p432_p11, %p429_p10 }
  0x3a   :  { %62 = vadd.xlane.f32.xlu1 %v61_v9 }
  0x3d   :  { %86 = vadd.xlane.f32.xlu0 %v85_v10 }
  0x3e   :  { %70 = vadd.xlane.f32.xlu1 %v69_v11 }
  0xc6   :  { %v79_v13 = vpop.xlane.xlu0 %78 }
  0xc7   :  { %v63_v14 = vpop.xlane.xlu1 %62  ;;  %v80_v15 = vmax.f32 %v79_v13, 1e-24 }
  0xc8   :  { %v64_v16 = vmax.f32 %v63_v14, 1e-24 }
  0xc9   :  { %342 = vrsqrt.f32 %v80_v15 }
  0xca   :  { %344 = vrsqrt.f32 %v64_v16  ;;  %v87_v17 = vpop.xlane.xlu0 %86 }
  0xcb   :  { %v71_v18 = vpop.xlane.xlu1 %70  ;;  %v88_v19 = vmax.f32 %v87_v17, 1e-24 }
  0xcc   :  { %v72_v20 = vmax.f32 %v71_v18, 1e-24 }
  0xcd   :  { %346 = vrsqrt.f32 %v88_v19 }
  0xce   :  { %348 = vrsqrt.f32 %v72_v20 }
  0xcf   :  { %350 = vrcp.f32 %v128_v39 }
  0xd3   :  { %v343_v21 = vpop.eup %342 }
  0xd4   :  { %v345_v22 = vpop.eup %344  ;;  %v82_v23 = vmul.f32 %v343_v21, %v75_v0 }
  0xd5   :  { %v66_v26 = vmul.f32 %v345_v22, %v58_v1 }
  0xd6   :  { %v133_v24 = vpack.c.bf16 %v82_v23, %v82_v23 }
  0xd7   :  { %v347_v25 = vpop.eup %346  ;;  %v132_v36 = vpack.c.bf16 %v66_v26, %v66_v26 }
  0xd8   :  { %v349_v27 = vpop.eup %348  ;;  %v138_v28 = vsel %vm60_vm0, %v133_v24, 0  ;;  %v90_v29 = vmul.f32 %v347_v25, %v83_v2 }
  0xd9   :  { %316 = vmatpush3.bf16.xpose.msra.mxu0 %v138_v28  ;;  %v74_v30 = vmul.f32 %v349_v27, %v67_v6  ;;  %v351_v53 = vpop.eup %350 }
  0xda   :  { %v183_v31 = vpack.c.bf16 %v90_v29, %v90_v29  ;;  %v99_v32 = vmul.f32 %v90_v29, %v82_v23 }
  0xdb   :  { %v113_v33 = vmul.f32 %v74_v30, %v66_v26  ;;  %v182_v38 = vpack.c.bf16 %v74_v30, %v74_v30 }
  0xdc   :  { %v188_v34 = vsel %vm60_vm0, %v183_v31, 0  ;;  %v100_v35 = vsel %vm60_vm0, %v99_v32, 0.0 }
  0xdd   :  { %322 = vmatpush3.bf16.xpose.msra.mxu1 %v188_v34  ;;  %101 = vadd.xlane.f32.xlu0 %v100_v35  ;;  %v114_v37 = vsel %vm60_vm0, %v113_v33, 0.0 }
  0xde   :  { %115 = vadd.xlane.f32.xlu1 %v114_v37 }
  0xe0   :  { %318 = vmatmul.mubr.msk.bf16.vlgmr.msra.gmra.mrb[0].mxu0 %vm60_vm0, %v132_v36 }
  0xe4   :  { %324 = vmatmul.mubr.msk.bf16.vlgmr.msra.gmra.mrb[0].mxu1 %vm60_vm0, %v182_v38 }
 0x16a   :  { %v102_v40 = vpop.xlane.xlu0 %101 }
 0x16b   :  { %v103_v41 = vrot.slane %v102_v40, 4  ;;  %v116_v42 = vpop.xlane.xlu1 %115 }
 0x16c   :  { %v117_v43 = vrot.slane %v116_v42, 4 }
 0x16d   :  { %v104_v44 = vadd.f32 %v103_v41, %v102_v40 }
 0x16e   :  { %v118_v45 = vadd.f32 %v117_v43, %v116_v42 }
 0x16f   :  { %v105_v46 = vrot.slane %v104_v44, 2 }
 0x170   :  { %v119_v47 = vrot.slane %v118_v45, 2 }
 0x171   :  { %v106_v48 = vadd.f32 %v105_v46, %v104_v44 }
 0x172   :  { %v120_v49 = vadd.f32 %v119_v47, %v118_v45 }
 0x173   :  { %v107_v50 = vrot.slane %v106_v48, 1 }
 0x174   :  { %v121_v51 = vrot.slane %v120_v49, 1 }
 0x175   :  { %v108_v52 = vadd.f32 %v107_v50, %v106_v48 }
 0x176   :  { %v122_v54 = vadd.f32 %v121_v51, %v120_v49 }
 0x177   :  { %327 = vpush %v108_v52 }
 0x178   :  { %329 = vpush %v122_v54 }
 0x179   :  { %331 = vpush %v351_v53 }
 0x1a8   :  { %s328_s29 = spop %327 }
 0x1a9   :  { %s282_s30 = smul.f32 0.125, %s328_s29  ;;  %s330_s6 = spop %329 }
 0x1aa   :  { %s332_s7 = spop %331  ;;  %s278_s9 = smul.f32 0.125, %s330_s6 }
 0x1ab   :  { %s283_s8 = ssub.f32 1.0, %s282_s30  ;;  %s131_s10 = smul.f32 100.0, %s332_s7 }
 0x1ac   :  { %s279_s11 = ssub.f32 1.0, %s278_s9 }
 0x1ad   :  { %285 = sst [smem:[#allocation9 + $0x1]] %s283_s8  ;;  %v180_v55 = vstv %s131_s10 }
 0x1ae   :  { %280 = sst [smem:[#allocation9]] %s279_s11 }
 0x1b3   :  { %v174_v56 = vpop.f32.mrb[0].mxu0 }
 0x1b4   :  { %v181_v57 = vmul.f32 %v180_v55, %v174_v56  ;;  %v319_v58 = vpop.f32.mrb[1].mxu0 }
 0x1b5   :  { %v177_v59 = vpop.f32.mrb[2].mxu0 }
 0x1b6   :  { %v320_v60 = vpop.f32.mrb[3].mxu0  ;;  %v232_v61 = vsel %vm231_vm2, %v181_v57, -inf }
 0x1b7   :  { %v224_v62 = vpop.f32.mrb[0].mxu1  ;;  %233 = vmax.xlane.f32.xlu0 %v232_v61 }
 0x1b8   :  { %v230_v63 = vmul.f32 %v224_v62, %v180_v55  ;;  %v325_v0 = vpop.f32.mrb[1].mxu1 }
 0x1b9   :  { %v227_v1 = vpop.f32.mrb[2].mxu1 }
 0x1ba   :  { %v326_v2 = vpop.f32.mrb[3].mxu1  ;;  %v244_v3 = vsel %vm231_vm2, %v230_v63, -inf }
 0x1bb   :  { %245 = vmax.xlane.f32.xlu1 %v244_v3 }
 0x244   :  { %v234_v4 = vpop.xlane.xlu0 %233 }
 0x245   :  { %v235_v5 = vsub.f32 %v181_v57, %v234_v4 }
 0x247   :  { %v236_v6 = vmul.f32 1.442695, %v235_v5 }
 0x248   :  { %v246_v7 = vpop.xlane.xlu1 %245 }
 0x249   :  { %352 = vpow2.f32 %v236_v6  ;;  %v247_v8 = vsub.f32 %v230_v63, %v246_v7 }
 0x24b   :  { %v248_v9 = vmul.f32 1.442695, %v247_v8 }
 0x24d   :  { %354 = vpow2.f32 %v248_v9 }
 0x253   :  { %v353_v10 = vpop.eup %352 }
 0x254   :  { %v238_v11 = vsel %vm231_vm2, %v353_v10, 0.0 }
 0x255   :  { %239 = vadd.xlane.f32.xlu0 %v238_v11 }
 0x257   :  { %v355_v12 = vpop.eup %354 }
 0x258   :  { %v250_v13 = vsel %vm231_vm2, %v355_v12, 0.0 }
 0x259   :  { %251 = vadd.xlane.f32.xlu1 %v250_v13 }
 0x2e2   :  { %v240_v14 = vpop.xlane.xlu0 %239 }
 0x2e3   :  { %356 = vlog2.f32 %v240_v14 }
 0x2e6   :  { %v252_v15 = vpop.xlane.xlu1 %251 }
 0x2e7   :  { %358 = vlog2.f32 %v252_v15 }
 0x2e8   :  { %360 = vrcp.f32 %v252_v15 }
 0x2ed   :  { %v357_v16 = vpop.eup %356 }
 0x2ee   :  { %v242_v17 = vmul.f32 0.6931472, %v357_v16 }
 0x2f0   :  { %v243_v21 = vsub.f32 %v235_v5, %v242_v17 }
 0x2f1   :  { %v359_v18 = vpop.eup %358 }
 0x2f2   :  { %v256_v19 = vmul.f32 0.6931472, %v359_v18  ;;  %v361_v20 = vpop.eup %360 }
 0x2f3   :  { %v254_v23 = vmul.f32 %v361_v20, %v355_v12 }
 0x2f4   :  { %v257_v22 = vsub.f32 %v247_v8, %v256_v19 }
 0x2f6   :  { %v259_v24 = vsub.f32 %v257_v22, %v243_v21 }
 0x2f8   :  { %v260_v25 = vmul.f32 %v259_v24, %v254_v23 }
 0x2fa   :  { %v261_v26 = vsel %vm231_vm2, %v260_v25, 0.0 }
 0x2fb   :  { %262 = vadd.xlane.f32.xlu0 %v261_v26 }
 0x388   :  { %v263_v27 = vpop.xlane.xlu0 %262 }
 0x389   :  { %v264_v28 = vrot.slane %v263_v27, 4 }
 0x38b   :  { %v265_v29 = vadd.f32 %v264_v28, %v263_v27 }
 0x38d   :  { %v266_v30 = vrot.slane %v265_v29, 2 }
 0x38f   :  { %v267_v31 = vadd.f32 %v266_v30, %v265_v29 }
 0x391   :  { %v268_v32 = vrot.slane %v267_v31, 1 }
 0x393   :  { %v269_v33 = vadd.f32 %v268_v32, %v267_v31 }
 0x395   :  { %333 = vpush %v269_v33 }
 0x3c6   :  { %s334_s12 = spop %333 }
 0x3c7   :  { %s287_s13 = smul.f32 0.125, %s334_s12 }
 0x3c9   :  { %s288_s15 = smul.f32 %s287_s13, %s555_s0 }
 0x3cb   :  { %s289_s18 = smul.f32 %s288_s15, %s555_s0 }
 0x3cd   :  { %290 = sst [smem:[#allocation9 + $0x2]] %s289_s18 }
 0x3ce   :  { %437 = shalt.err (!%p434_p12)
}
 0x3cf   :  { %s449_s1 = smov [#allocation9]  }
 0x3d0   :  { %298 = dma.smem_to_hbm %s449_s1, 16, %s560_s5, [#allocation5]  }
 0x3d1   :  { %442 = dma.done.wait [#allocation5], 16  }
 0x3d2   :  { %443 = vsyncadd [#allocation5], 4294967280 }
 0x3d3   :  { %302 = sfence }
 0x3d4   :  { %303 = vsyncpa [#allocation4], 1 }
 0x3d5   :  { %304 = vsyncpa [#allocation7], 1 }
 0x3d6   :  { %305 = vsyncpa [#allocation5], 1 }

</bundles_post_ra>
